<compile_context>
chip_gen: v7x
topology: tpu7x:2x2x1
jax: 0.10.0
libtpu: 0.0.40
codegen_flags: <defaults>
</compile_context>

<pallas_src>
import jax
import jax.numpy as jnp
from jax.experimental import pallas as pl
from jax.experimental.pallas import tpu as pltpu


_NEG_INF = -1e30


def _infer_kernel(idx_ref, table_ref, logits_ref):
    """Embedding lookup only (y is None path): one-hot(idx) @ table on the MXU."""
    tn = idx_ref.shape[0]
    Vp = table_ref.shape[1]
    idx = idx_ref[...]                                             # (tn, 1) int32
    lane = jax.lax.broadcasted_iota(jnp.int32, (tn, Vp), 1)
    onehot = (lane == idx).astype(jnp.float32)                     # (tn, Vp)
    logits_ref[...] = jnp.dot(onehot, table_ref[...],
                              preferred_element_type=jnp.float32)  # (tn, Vp)


def _make_train_kernel(V, N, row_tile):
    """Embedding lookup + per-row cross-entropy. V/N/row_tile are static."""

    def kernel(tok_ref, table_ref, logits_ref, row_loss_ref):
        i = pl.program_id(0)
        tn = tok_ref.shape[0]
        Vp = table_ref.shape[1]

        tok = tok_ref[...]                                         # (tn, 2) int32
        idx = tok[:, 0:1]                                          # (tn, 1)
        tgt = tok[:, 1:2]                                          # (tn, 1)
        lane = jax.lax.broadcasted_iota(jnp.int32, (tn, Vp), 1)

        # Embedding lookup as a lane-aligned one-hot matmul (MXU).
        onehot = (lane == idx).astype(jnp.float32)                 # (tn, Vp)
        logits = jnp.dot(onehot, table_ref[...],
                         preferred_element_type=jnp.float32)       # (tn, Vp)
        logits_ref[...] = logits

        # Cross-entropy per row over the *valid* V columns only.
        masked = jnp.where(lane < V, logits, _NEG_INF)
        m = jnp.max(masked, axis=-1, keepdims=True)
        lse = jnp.log(jnp.sum(jnp.exp(masked - m), axis=-1, keepdims=True)) + m
        tgt_onehot = (lane == tgt).astype(jnp.float32)
        correct = jnp.sum(tgt_onehot * logits, axis=-1, keepdims=True)
        row_loss = lse - correct                                   # (tn, 1)

        # Zero out padded tail rows so the wrapper-side sum is exact.
        row = jax.lax.broadcasted_iota(jnp.int32, (tn, 1), 0) + i * row_tile
        row_loss_ref[...] = jnp.where(row < N, row_loss, 0.0)

    return kernel


def _round_up(a, b):
    return ((a + b - 1) // b) * b


def bigram_forward(x, table, y=None, *, row_tile=512):
    """Pallas implementation of BigramLanguageMode.forward.

    x: (B, T) int token indices
    table: (V, V) float32 embedding table
    y: optional (B, T) int targets
    Returns (logits (B, T, V) float32, loss scalar or None).
    """
    B, T = x.shape
    V = table.shape[0]
    N = B * T

    # Lane-dense vocab padding and row tiling.
    Vp = _round_up(V, 128)
    rt = min(row_tile, _round_up(N, 8))       # one big tile when N is small
    N_pad = _round_up(N, rt)
    grid = (N_pad // rt,)

    # Zero-pad the table to (Vp, Vp); padded logits columns are 0 and get
    # masked inside the loss and sliced off below.
    table_p = jnp.zeros((Vp, Vp), jnp.float32).at[:V, :V].set(
        table.astype(jnp.float32))

    idx = x.reshape(N).astype(jnp.int32)

    if y is None:
        idx_p = jnp.zeros((N_pad, 1), jnp.int32).at[:N, 0].set(idx)
        logits_p = pl.pallas_call(
            _infer_kernel,
            out_shape=jax.ShapeDtypeStruct((N_pad, Vp), jnp.float32),
            grid_spec=pltpu.PrefetchScalarGridSpec(
                num_scalar_prefetch=0,
                grid=grid,
                in_specs=[
                    pl.BlockSpec((rt, 1), lambda i: (i, 0)),       # idx
                    pl.BlockSpec((Vp, Vp), lambda i: (0, 0)),      # table (resident)
                ],
                out_specs=pl.BlockSpec((rt, Vp), lambda i: (i, 0)),
            ),
            compiler_params=pltpu.CompilerParams(
                dimension_semantics=("parallel",),
            ),
        )(idx_p, table_p)
        logits = logits_p[:N, :V].reshape(B, T, V)
        return logits, None

    tgt = y.reshape(N).astype(jnp.int32)
    tok = (jnp.zeros((N_pad, 2), jnp.int32)
           .at[:N, 0].set(idx)
           .at[:N, 1].set(tgt))

    kernel = _make_train_kernel(V, N, rt)
    logits_p, row_loss = pl.pallas_call(
        kernel,
        out_shape=(
            jax.ShapeDtypeStruct((N_pad, Vp), jnp.float32),
            jax.ShapeDtypeStruct((N_pad, 1), jnp.float32),
        ),
        grid_spec=pltpu.PrefetchScalarGridSpec(
            num_scalar_prefetch=0,
            grid=grid,
            in_specs=[
                pl.BlockSpec((rt, 2), lambda i: (i, 0)),           # fused idx/tgt
                pl.BlockSpec((Vp, Vp), lambda i: (0, 0)),          # table (resident)
            ],
            out_specs=[
                pl.BlockSpec((rt, Vp), lambda i: (i, 0)),          # logits
                pl.BlockSpec((rt, 1), lambda i: (i, 0)),           # per-row loss
            ],
        ),
        compiler_params=pltpu.CompilerParams(
            dimension_semantics=("parallel",),                     # no serial accumulator
        ),
    )(tok, table_p)

    logits = logits_p[:N, :V].reshape(B, T, V)
    loss = jnp.sum(row_loss) / N
    return logits, loss


def _reference_forward(x, table, y=None):
    logits = table[x]                                              # (B, T, V)
    if y is None:
        return logits, None
    B, T, V = logits.shape
    lf = logits.reshape(B * T, V).astype(jnp.float32)
    yf = y.reshape(B * T)
    lse = jax.scipy.special.logsumexp(lf, axis=-1)
    correct = jnp.take_along_axis(lf, yf[:, None], axis=-1)[:, 0]
    return logits, jnp.mean(lse - correct)


if __name__ == "__main__":
    # Synthetic "Shakespeare" setup: vocab_size = 65, batch = 2, block/seq = 8.
    vocab_size = 65
    B, T = 2, 8

    key = jax.random.PRNGKey(0)
    k_table, k_x, k_y = jax.random.split(key, 3)

    # nn.Embedding default init: N(0, 1)
    table = jax.random.normal(k_table, (vocab_size, vocab_size), jnp.float32)
    x = jax.random.randint(k_x, (B, T), 0, vocab_size, jnp.int32)
    y = jax.random.randint(k_y, (B, T), 0, vocab_size, jnp.int32)

    logits, loss = bigram_forward(x, table, y)
    logits = jax.block_until_ready(logits)
    loss = jax.block_until_ready(loss)

    # Also exercise the y=None (inference) path.
    logits_only, loss_none = bigram_forward(x, table, None)
    logits_only = jax.block_until_ready(logits_only)
    assert loss_none is None

    ref_logits, ref_loss = _reference_forward(x, table, y)
    assert jnp.allclose(logits, ref_logits, atol=1e-5, rtol=1e-5)
    assert jnp.allclose(logits_only, ref_logits, atol=1e-5, rtol=1e-5)
    assert jnp.allclose(loss, ref_loss, atol=1e-5, rtol=1e-5)

    print("KERNEL_OK")
</pallas_src>

<mosaic_0001>
module attributes {stable_mosaic.version = 11 : i64} {
  func.func @kernel(%arg0: i32, %arg1: memref<16x2xi32, #tpu.memory_space<vmem>>, %arg2: memref<128x128xf32, #tpu.memory_space<vmem>>, %arg3: memref<16x128xf32, #tpu.memory_space<vmem>>, %arg4: memref<16x1xf32, #tpu.memory_space<vmem>>) attributes {dimension_semantics = [#tpu.dimension_semantics<parallel>], iteration_bounds = array<i64: 1>, scalar_prefetch = 0 : i64, scratch_operands = 0 : i64, tpu.core_type = #tpu.core_type<tc>, window_params = [{transform_indices = @transform_0, window_bounds = array<i64: 16, 2>}, {pipeline_mode = #tpu.pipeline_mode<synchronous>, transform_indices = @transform_1, window_bounds = array<i64: 128, 128>}, {transform_indices = @transform_2, window_bounds = array<i64: 16, 128>}, {transform_indices = @transform_3, window_bounds = array<i64: 16, 1>}]} {
    %c0 = arith.constant 0 : index
    %c0_0 = arith.constant 0 : index
    %0 = vector.load %arg1[%c0, %c0_0] : memref<16x2xi32, #tpu.memory_space<vmem>>, vector<16x2xi32>
    %1 = vector.extract_strided_slice %0 {offsets = [0, 0], sizes = [16, 1], strides = [1, 1]} : vector<16x2xi32> to vector<16x1xi32>
    %2 = vector.extract_strided_slice %0 {offsets = [0, 1], sizes = [16, 1], strides = [1, 1]} : vector<16x2xi32> to vector<16x1xi32>
    %3 = tpu.iota {dimensions = array<i32: 1>} : vector<16x128xi32>
    %4 = vector.broadcast %1 : vector<16x1xi32> to vector<16x128xi32>
    %5 = arith.cmpi eq, %3, %4 : vector<16x128xi32>
    %6 = arith.extui %5 : vector<16x128xi1> to vector<16x128xi32>
    %7 = arith.sitofp %6 : vector<16x128xi32> to vector<16x128xf32>
    %c0_1 = arith.constant 0 : index
    %c0_2 = arith.constant 0 : index
    %8 = vector.load %arg2[%c0_1, %c0_2] : memref<128x128xf32, #tpu.memory_space<vmem>>, vector<128x128xf32>
    %cst = arith.constant dense<0.000000e+00> : vector<16x128xf32>
    %9 = tpu.matmul %7, %8, %cst {dimension_numbers = #tpu.dot_dimension_numbers<[1], [0], [0], [1], [0, 0, 1, 1], [], []>} : vector<16x128xf32>, vector<128x128xf32>, vector<16x128xf32> -> vector<16x128xf32>
    %c0_3 = arith.constant 0 : index
    %c0_4 = arith.constant 0 : index
    %10 = vector.load %arg3[%c0_3, %c0_4] : memref<16x128xf32, #tpu.memory_space<vmem>>, vector<16x128xf32>
    tpu.vector_store %arg3[%c0_3, %c0_4], %9 {strides = array<i32>} : memref<16x128xf32, #tpu.memory_space<vmem>>, vector<16x128xf32>,
    %c65_i32 = arith.constant 65 : i32
    %11 = vector.broadcast %c65_i32 : i32 to vector<16x128xi32>
    %12 = arith.cmpi slt, %3, %11 : vector<16x128xi32>
    %cst_5 = arith.constant -1.000000e+30 : f32
    %13 = vector.broadcast %cst_5 : f32 to vector<16x128xf32>
    %14 = arith.select %12, %9, %13 : vector<16x128xi1>, vector<16x128xf32>
    %cst_6 = arith.constant dense<0xFF800000> : vector<16xf32>
    %15 = vector.multi_reduction <maximumf>, %14, %cst_6 [1] : vector<16x128xf32> to vector<16xf32>
    %16 = vector.shape_cast %15 : vector<16xf32> to vector<16x1xf32>
    %17 = vector.broadcast %16 : vector<16x1xf32> to vector<16x128xf32>
    %18 = arith.subf %14, %17 : vector<16x128xf32>
    %19 = math.exp %18 : vector<16x128xf32>
    %cst_7 = arith.constant dense<0.000000e+00> : vector<16xf32>
    %20 = vector.multi_reduction <add>, %19, %cst_7 [1] : vector<16x128xf32> to vector<16xf32>
    %21 = vector.shape_cast %20 : vector<16xf32> to vector<16x1xf32>
    %22 = math.log %21 : vector<16x1xf32>
    %23 = arith.addf %22, %16 : vector<16x1xf32>
    %24 = vector.broadcast %2 : vector<16x1xi32> to vector<16x128xi32>
    %25 = arith.cmpi eq, %3, %24 : vector<16x128xi32>
    %26 = arith.extui %25 : vector<16x128xi1> to vector<16x128xi32>
    %27 = arith.sitofp %26 : vector<16x128xi32> to vector<16x128xf32>
    %28 = arith.mulf %27, %9 : vector<16x128xf32>
    %cst_8 = arith.constant dense<0.000000e+00> : vector<16xf32>
    %29 = vector.multi_reduction <add>, %28, %cst_8 [1] : vector<16x128xf32> to vector<16xf32>
    %30 = vector.shape_cast %29 : vector<16xf32> to vector<16x1xf32>
    %31 = arith.subf %23, %30 : vector<16x1xf32>
    %32 = tpu.iota {dimensions = array<i32: 0>} : vector<16x1xi32>
    %c16_i32 = arith.constant 16 : i32
    %33 = arith.muli %arg0, %c16_i32 : i32
    %34 = vector.broadcast %33 : i32 to vector<16x1xi32>
    %35 = arith.addi %32, %34 : vector<16x1xi32>
    %c16_i32_9 = arith.constant 16 : i32
    %36 = vector.broadcast %c16_i32_9 : i32 to vector<16x1xi32>
    %37 = arith.cmpi slt, %35, %36 : vector<16x1xi32>
    %cst_10 = arith.constant 0.000000e+00 : f32
    %38 = vector.broadcast %cst_10 : f32 to vector<16x1xf32>
    %39 = arith.select %37, %31, %38 : vector<16x1xi1>, vector<16x1xf32>
    %c0_11 = arith.constant 0 : index
    %c0_12 = arith.constant 0 : index
    %40 = vector.load %arg4[%c0_11, %c0_12] : memref<16x1xf32, #tpu.memory_space<vmem>>, vector<16x1xf32>
    tpu.vector_store %arg4[%c0_11, %c0_12], %39 {strides = array<i32>} : memref<16x1xf32, #tpu.memory_space<vmem>>, vector<16x1xf32>,
    return
  }
  func.func @transform_0(%arg0: i32) -> (i32, i32) {
    %c0_i32 = arith.constant 0 : i32
    %c0_i32_0 = arith.constant 0 : i32
    return %arg0, %c0_i32 : i32, i32
  }
  func.func @transform_1(%arg0: i32) -> (i32, i32) {
    %c0_i32 = arith.constant 0 : i32
    %c0_i32_0 = arith.constant 0 : i32
    %c0_i32_1 = arith.constant 0 : i32
    return %c0_i32, %c0_i32_0 : i32, i32
  }
  func.func @transform_2(%arg0: i32) -> (i32, i32) {
    %c0_i32 = arith.constant 0 : i32
    %c0_i32_0 = arith.constant 0 : i32
    return %arg0, %c0_i32 : i32, i32
  }
  func.func @transform_3(%arg0: i32) -> (i32, i32) {
    %c0_i32 = arith.constant 0 : i32
    %c0_i32_0 = arith.constant 0 : i32
    return %arg0, %c0_i32 : i32, i32
  }
}

</mosaic_0001>

<bundles_post_ra>
// kernel: tpu_custom_call.1
= control target key start
LH: loop header
LB: loop body
LE: loop exit
PB: predicated region body
PF: predicated region fallthrough
CT: control target
= control target key end

     0   :  { %9 = vsyncpa [#allocation3], 0  ;;  %s443_s0 = inlined_call_operand.vmem [shape: s32[16,2], index: 0, kind: input, shape index: {}]   ;;  %s444_s1 = inlined_call_operand.hbm [shape: f32[128,128], index: 1, kind: input, shape index: {}]   ;;  %s445_s2 = inlined_call_operand.hbm [shape: f32[16,128], index: 2, kind: output, shape index: {0}]   ;;  %s446_s3 = inlined_call_operand.vmem [shape: f32[16,1], index: 3, kind: output, shape index: {1}]  }
   0x1   :  { %10 = vsyncpa [#allocation4], 0  ;;  %s373_s12 = smov [#allocation2]   ;;  %s325_s16 = scalar_lea.hbm %s444_s1, 2048 }
   0x2   :  { %s18_s13 = sshll.u32 %s373_s12, 4  ;;  %p326_p0 = scmp.ne.s32.totalorder %s444_s1, %s325_s16  ;;  %s19_s13 = int_to_ptr.vmem [resolvable:$true] %s18_s13 }
   0x3   :  { %p329_p1 = scmp.lt.u32.totalorder %s325_s16, %s444_s1 }
   0x5   :  { %p331_p2 = pnand %p329_p1, %p326_p0 }
   0x7   :  { %334 = shalt.err (!%p331_p2)
}
   0x8   :  { %s335_s21 = scalar_lea.vmem %s19_s13, 2048  ;;  %p340_p4 = scmp.lt.s32.totalorder %s19_s13, %s19_s13 }
   0x9   :  { %p336_p3 = scmp.ne.s32.totalorder %s19_s13, %s335_s21  ;;  %p341_p5 = scmp.lt.s32.totalorder %s335_s21, %s335_s21 }
   0xb   :  { %p342_p6 = por %p341_p5, %p340_p4 }
   0xd   :  { %p343_p7 = pnand %p342_p6, %p336_p3 }
   0xf   :  { %346 = shalt.err (!%p343_p7)
}
  0x10   :  { %s374_s22 = smov 128   ;;  %s375_s23 = smov 8  }
  0x11   :  { %24 = dma.hbm_to_vmem [thread:$0]  %s444_s1, 2048, %s19_s13, [#allocation3], %s374_s22, %s374_s22, %s375_s23  }
  0x12   :  { %369 = dma.done.wait [#allocation3], 2048  }
  0x13   :  { %370 = vsyncadd [#allocation3], 4294965248  ;;  %v376_v0 = vmov 0   ;;  %v28_v1 = vld [vmem:[%s443_s0] sm:$0xff]  ;;  %v45_v3 = vld [vmem:[#allocation2 + $0x8] sm:$0xff]  ;;  %v377_v14 = vmov 1   ;;  %v30_v28 = vlaneseq }
  0x14   :  { %314 = vset.pattern.permute.xlu0 %v376_v0  ;;  %v44_v2 = vld [vmem:[#allocation2] sm:$0xff]  ;;  %v46_v4 = vld [vmem:[#allocation2 + $0x10] sm:$0xff]  ;;  %v47_v5 = vld [vmem:[#allocation2 + $0x18] sm:$0xff]  ;;  %316 = vset.pattern.permute.xlu1 %v377_v14  ;;  %v378_v31 = vmov 1.0   ;;  %v379_v47 = vmov 0.0  }
  0x15   :  { %33 = vperm.xlu0 %314, %v28_v1   ;;  %v29_v6 = vld [vmem:[%s443_s0 + $0x8] sm:$0xff]  ;;  %v274_v7 = vpack.c.bf16 %v45_v3, %v44_v2  ;;  %v278_v8 = vpack.c.bf16 %v47_v5, %v46_v4  ;;  %v48_v9 = vld [vmem:[#allocation2 + $0x20] sm:$0xff]  ;;  %v50_v12 = vld [vmem:[#allocation2 + $0x30] sm:$0xff]  ;;  %v31_v29 = vand.u32 127, %v30_v28  ;;  %s380_s0 = smov [#allocation5]  }
  0x16   :  { %v49_v10 = vld [vmem:[#allocation2 + $0x28] sm:$0xff]  ;;  %v51_v13 = vld [vmem:[#allocation2 + $0x38] sm:$0xff]  ;;  %v52_v16 = vld [vmem:[#allocation2 + $0x40] sm:$0xff]  ;;  %s199_s1 = sshll.u32 %s380_s0, 4  ;;  %s200_s1 = int_to_ptr.vmem [resolvable:$true] %s199_s1 }
  0x17   :  { %275 = vmatprep.subr.bf16.mxu0 %v274_v7  ;;  %v282_v11 = vpack.c.bf16 %v49_v10, %v48_v9  ;;  %v286_v15 = vpack.c.bf16 %v51_v13, %v50_v12  ;;  %v53_v17 = vld [vmem:[#allocation2 + $0x48] sm:$0xff]  ;;  %v54_v19 = vld [vmem:[#allocation2 + $0x50] sm:$0xff]  ;;  %v55_v20 = vld [vmem:[#allocation2 + $0x58] sm:$0xff]  ;;  %vm137_vm2 = vcmp.lt.s32.totalorder %v31_v29, 65  ;;  %s347_s30 = scalar_lea.vmem %s200_s1, 256  ;;  %p352_p9 = scmp.lt.s32.totalorder %s200_s1, %s200_s1 }
  0x18   :  { %277 = vmatpush3.bf16.msra.mxu0 %v274_v7  ;;  %v290_v18 = vpack.c.bf16 %v53_v17, %v52_v16  ;;  %v294_v21 = vpack.c.bf16 %v55_v20, %v54_v19  ;;  %v56_v22 = vld [vmem:[#allocation2 + $0x60] sm:$0xff]  ;;  %v57_v23 = vld [vmem:[#allocation2 + $0x68] sm:$0xff]  ;;  %v58_v25 = vld [vmem:[#allocation2 + $0x70] sm:$0xff]  ;;  %p348_p8 = scmp.ne.s32.totalorder %s200_s1, %s347_s30  ;;  %p353_p10 = scmp.lt.s32.totalorder %s347_s30, %s347_s30 }
  0x19   :  { %36 = vperm.xlu0 %314, %v29_v6   ;;  %279 = vmatprep.subr.bf16.mxu0 %v278_v8  ;;  %v298_v24 = vpack.c.bf16 %v57_v23, %v56_v22  ;;  %v59_v26 = vld [vmem:[#allocation2 + $0x78] sm:$0xff] }
  0x1a   :  { %v302_v27 = vpack.c.bf16 %v59_v26, %v58_v25  ;;  %p354_p11 = por %p353_p10, %p352_p9 }
  0x1c   :  { %281 = vmatpush3.bf16.msra.mxu0 %v278_v8  ;;  %p355_p12 = pnand %p354_p11, %p348_p8 }
  0x1d   :  { %315 = vset.pattern.permute.xlu0 %v377_v14  ;;  %283 = vmatprep.subr.bf16.mxu0 %v282_v11 }
  0x1e   :  { %161 = vperm.xlu0 %315, %v28_v1  }
  0x20   :  { %285 = vmatpush3.bf16.msra.mxu0 %v282_v11 }
  0x21   :  { %287 = vmatprep.subr.bf16.mxu0 %v286_v15 }
  0x24   :  { %289 = vmatpush3.bf16.msra.mxu0 %v286_v15 }
  0x25   :  { %291 = vmatprep.subr.bf16.mxu0 %v290_v18 }
  0x28   :  { %293 = vmatpush3.bf16.msra.mxu0 %v290_v18 }
  0x29   :  { %295 = vmatprep.subr.bf16.mxu0 %v294_v21 }
  0x2c   :  { %297 = vmatpush3.bf16.msra.mxu0 %v294_v21 }
  0x2d   :  { %299 = vmatprep.subr.bf16.mxu0 %v298_v24 }
  0x30   :  { %301 = vmatpush3.bf16.msra.mxu0 %v298_v24 }
  0x31   :  { %303 = vmatprep.subr.bf16.mxu0 %v302_v27 }
  0x34   :  { %305 = vmatpush3.bf16.msra.mxu0 %v302_v27 }
  0x94   :  { %v34_v30 = vpop.permute.xlu0 %33 }
  0x95   :  { %vm38_vm0 = vcmp.eq.s32.totalorder %v31_v29, %v34_v30 }
  0x96   :  { %271 = vmatprep.mubr.msk.f32.mxu0 %vm38_vm0, %v378_v31 }
  0x98   :  { %v37_v32 = vpop.permute.xlu0 %36 }
  0x99   :  { %vm39_vm1 = vcmp.eq.s32.totalorder %v31_v29, %v37_v32 }
  0x9a   :  { %272 = vmatmul.mubr.msk.f32.vlgmr.msra.gmra.mrb[0].mxu0 %vm39_vm1, %v378_v31 }
  0x9d   :  { %v162_v43 = vpop.permute.xlu0 %161 }
  0x9e   :  { %vm166_vm3 = vcmp.eq.s32.totalorder %v31_v29, %v162_v43 }
  0x9f   :  { %v219_v48 = vsel %vm166_vm3, 1.0, %v379_v47 }
 0x16d   :  { %v273_v33 = vpop.f32.mrb[0].mxu0 }
 0x16e   :  { %136 = vst [vmem:[#allocation5 + $0x8] sm:$0xff] %v273_v33  ;;  %v126_v34 = vpop.f32.mrb[1].mxu0  ;;  %v139_v35 = vsel %vm137_vm2, %v273_v33, -1e+30 }
 0x16f   :  { %135 = vst [vmem:[#allocation5] sm:$0xff] %v126_v34  ;;  %142 = vmax.xlane.f32.xlu1 %v139_v35  ;;  %v138_v36 = vsel %vm137_vm2, %v126_v34, -1e+30  ;;  %v172_v49 = vmul.f32 %v219_v48, %v126_v34 }
 0x173   :  { %140 = vmax.xlane.f32.xlu1 %v138_v36 }
 0x184   :  { %164 = vperm.xlu1 %316, %v29_v6  }
 0x1fc   :  { %v143_v37 = vpop.xlane.xlu1 %142 }
 0x1fd   :  { %v145_v38 = vsub.f32 %v139_v35, %v143_v37 }
 0x1ff   :  { %v148_v39 = vmul.f32 1.442695, %v145_v38 }
 0x200   :  { %v141_v40 = vpop.xlane.xlu1 %140 }
 0x201   :  { %317 = vpow2.f32 %v148_v39  ;;  %v144_v41 = vsub.f32 %v138_v36, %v141_v40 }
 0x203   :  { %v146_v42 = vmul.f32 1.442695, %v144_v41 }
 0x204   :  { %v165_v45 = vpop.permute.xlu1 %164 }
 0x205   :  { %319 = vpow2.f32 %v146_v42  ;;  %vm167_vm4 = vcmp.eq.s32.totalorder %v31_v29, %v165_v45 }
 0x206   :  { %v220_v50 = vsel %vm167_vm4, 1.0, %v379_v47 }
 0x207   :  { %v173_v51 = vmul.f32 %v273_v33, %v220_v50 }
 0x20b   :  { %v318_v44 = vpop.eup %317 }
 0x20c   :  { %152 = vadd.xlane.f32.xlu1 %v318_v44 }
 0x20f   :  { %v320_v46 = vpop.eup %319 }
 0x210   :  { %150 = vadd.xlane.f32.xlu0 %v320_v46 }
 0x214   :  { %174 = vadd.xlane.f32.xlu0 %v172_v49 }
 0x218   :  { %176 = vadd.xlane.f32.xlu0 %v173_v51 }
 0x219   :  { %358 = shalt.err (!%p355_p12)
}
 0x21a   :  { %s359_s6 = scalar_lea.hbm %s445_s2, 256 }
 0x21b   :  { %p360_p13 = scmp.ne.s32.totalorder %s445_s2, %s359_s6  ;;  %p363_p0 = scmp.lt.u32.totalorder %s359_s6, %s445_s2 }
 0x21d   :  { %p365_p1 = pnand %p363_p0, %p360_p13 }
 0x21f   :  { %368 = shalt.err (!%p365_p1)
}
 0x220   :  { %205 = dma.vmem_to_hbm [thread:$0]  %s200_s1, 256, %s445_s2, [#allocation4], %s374_s22, %s374_s22, %s375_s23   ;;  %vm191_vm5 = vcmask 7168  }
 0x299   :  { %v153_v52 = vpop.xlane.xlu1 %152 }
 0x29a   :  { %321 = vlog2.f32 %v153_v52 }
 0x29d   :  { %v151_v53 = vpop.xlane.xlu0 %150 }
 0x29e   :  { %323 = vlog2.f32 %v151_v53 }
 0x2a1   :  { %v175_v54 = vpop.xlane.xlu0 %174 }
 0x2a4   :  { %v322_v55 = vpop.eup %321 }
 0x2a5   :  { %v157_v56 = vmul.f32 0.6931472, %v322_v55  ;;  %v177_v59 = vpop.xlane.xlu0 %176 }
 0x2a7   :  { %v159_v57 = vadd.f32 %v157_v56, %v143_v37 }
 0x2a8   :  { %v324_v58 = vpop.eup %323 }
 0x2a9   :  { %v155_v60 = vmul.f32 0.6931472, %v324_v58  ;;  %v179_v61 = vsub.f32 %v159_v57, %v177_v59 }
 0x2ab   :  { %v158_v62 = vadd.f32 %v155_v60, %v141_v40  ;;  %193 = vst.msk [vmem:[%s446_s3 + $0x8] sm:$0xff] %vm191_vm5, %v179_v61 }
 0x2ad   :  { %v178_v63 = vsub.f32 %v158_v62, %v175_v54 }
 0x2af   :  { %192 = vst.msk [vmem:[%s446_s3] sm:$0xff] %vm191_vm5, %v178_v63 }
 0x2b0   :  { %371 = dma.done.wait [#allocation4], 256  }
 0x2b1   :  { %372 = vsyncadd [#allocation4], 4294967040 }
 0x2b2   :  { %213 = vsyncpa [#allocation3], 1 }
 0x2b3   :  { %214 = vsyncpa [#allocation4], 1 }

</bundles_post_ra>
